<compile_context>
chip_gen: v6e
topology: v6e:2x2x1
jax: 0.10.0
libtpu: 0.0.40
codegen_flags: <defaults>
</compile_context>

<pallas_src>
import functools

import jax
import jax.numpy as jnp
from jax.experimental import pallas as pl
from jax.experimental.pallas import tpu as pltpu


def mlp_kernel(x_ref,
               w1_ref, b1_ref,
               w2_ref, b2_ref,
               w3_ref, b3_ref,
               w4_ref, b4_ref,
               o_ref):
    # Transposed dataflow: batch on the lane axis.  x_ref is (2, TB).
    a_row = x_ref[0:1, :]                          # (1, TB)
    xn_row = x_ref[1:2, :]                         # (1, TB)

    # Layer 1 (2 -> 128): contraction depth 2 -> pure VPU broadcast-FMA.
    h = (w1_ref[:, 0:1] * a_row
         + w1_ref[:, 1:2] * xn_row
         + b1_ref[...])                            # (128, TB) f32
    h = jnp.maximum(h, 0.0)

    # Layer 2 (128 -> 256): MXU, bf16 operands (default) with f32 accumulation.
    h = jnp.dot(w2_ref[...], h.astype(w2_ref.dtype),
                preferred_element_type=jnp.float32) + b2_ref[...]
    h = jnp.maximum(h, 0.0)                        # (256, TB) f32

    # Layer 3 (256 -> 128): MXU, f32 accumulation.
    h = jnp.dot(w3_ref[...], h.astype(w3_ref.dtype),
                preferred_element_type=jnp.float32) + b3_ref[...]
    h = jnp.maximum(h, 0.0)                        # (128, TB) f32

    # Layer 4 (128 -> 1): VPU multiply + sublane (XLU) reduction -> lane-dense row.
    logit = jnp.sum(h * w4_ref[...], axis=0, keepdims=True) + b4_ref[...]  # (1, TB)

    # Sigmoid on the EUP over a lane-dense row; lane-dense stores.
    o_ref[...] = jax.nn.sigmoid(logit)


def _round_up(n, m):
    return ((n + m - 1) // m) * m


@functools.partial(jax.jit, static_argnames=("block_b", "matmul_dtype"))
def iterative_logistic_predictor(x, params, *, block_b=2048,
                                 matmul_dtype=jnp.bfloat16):
    """Forward pass.

    x: (B, 2) float32.
    params: ((w1,b1),...,(w4,b4)) with W in PyTorch layout (out_features, in_features).
    block_b: max batch tile size.  Per-step working set is only a few MiB even
             at 2048-4096, so the scoped-VMEM default is plenty on v5e/v6e/v7x.
    matmul_dtype: dtype of the two MXU matmul operands.  bfloat16 (default)
             gives 2-4x MXU throughput with f32 accumulation; pass jnp.float32
             for exact (1e-5) parity with an f32 reference.
    """
    (w1, b1), (w2, b2), (w3, b3), (w4, b4) = params
    B = x.shape[0]

    # Tile selection:
    #   * tiny batch: one tile, rounded to 8 sublanes (full-dim exception).
    #   * otherwise: multiple of 128 lanes, capped by block_b, and at least
    #     2 grid steps so the "parallel" axis can shard across v7x's 2 TCs.
    if B <= 128:
        tb = _round_up(B, 8)
    else:
        tb = min(block_b, _round_up(pl.cdiv(B, 2), 128))
    b_pad = _round_up(B, tb)
    num_tiles = b_pad // tb

    # Batch on the lane axis: x as (2, b_pad).
    xt = x.T
    if b_pad != B:
        xt = jnp.pad(xt, ((0, 0), (0, b_pad - B)))

    w2c = w2.astype(matmul_dtype)                  # (256, 128)
    w3c = w3.astype(matmul_dtype)                  # (128, 256)
    w4c = w4.reshape(-1, 1)                        # (128, 1) column
    b1c = b1.reshape(-1, 1)                        # (128, 1)
    b2c = b2.reshape(-1, 1)                        # (256, 1)
    b3c = b3.reshape(-1, 1)                        # (128, 1)
    b4c = b4.reshape(1, 1)                         # (1, 1)

    def resident(arr):
        # Constant index_map: block is DMA'd once and stays resident in VMEM.
        return pl.BlockSpec(arr.shape, lambda i: (0, 0))

    flops = 2 * b_pad * (2 * 128 + 128 * 256 + 256 * 128 + 128)
    bytes_accessed = (xt.size * 4
                      + w1.size * 4 + b1.size * 4
                      + w2c.size * w2c.dtype.itemsize + b2.size * 4
                      + w3c.size * w3c.dtype.itemsize + b3.size * 4
                      + w4.size * 4 + b4.size * 4
                      + b_pad * 4)

    out = pl.pallas_call(
        mlp_kernel,
        out_shape=jax.ShapeDtypeStruct((1, b_pad), jnp.float32),
        grid=(num_tiles,),
        in_specs=[
            pl.BlockSpec((2, tb), lambda i: (0, i)),   # x tile (pipelined, lane-major batch)
            resident(w1), resident(b1c),               # layer 1
            resident(w2c), resident(b2c),              # layer 2
            resident(w3c), resident(b3c),              # layer 3
            resident(w4c), resident(b4c),              # layer 4
        ],
        out_specs=pl.BlockSpec((1, tb), lambda i: (0, i)),   # lane-dense output row
        compiler_params=pltpu.CompilerParams(
            dimension_semantics=("parallel",)),
        cost_estimate=pl.CostEstimate(
            flops=flops, transcendentals=b_pad, bytes_accessed=bytes_accessed),
    )(xt,
      w1, b1c,
      w2c, b2c,
      w3c, b3c,
      w4c, b4c)

    return out.reshape(b_pad, 1)[:B]


def make_params(key, input_size=2, hidden_sizes=(128, 256, 128), output_size=1):
    """Deterministic synthetic parameters in PyTorch nn.Linear layout: W (out, in), b (out,)."""
    sizes = [input_size, *hidden_sizes, output_size]
    params = []
    for fan_in, fan_out in zip(sizes[:-1], sizes[1:]):
        key, kw, kb = jax.random.split(key, 3)
        bound = 1.0 / jnp.sqrt(fan_in)  # mimic PyTorch Linear default init scale
        w = jax.random.uniform(kw, (fan_out, fan_in), jnp.float32, -bound, bound)
        b = jax.random.uniform(kb, (fan_out,), jnp.float32, -bound, bound)
        params.append((w, b))
    return params


def reference_forward(x, params):
    h = x
    n = len(params)
    for i, (w, b) in enumerate(params):
        h = h @ w.T + b
        h = jnp.maximum(h, 0.0) if i < n - 1 else jax.nn.sigmoid(h)
    return h


if __name__ == "__main__":
    key = jax.random.PRNGKey(0)
    key, kx = jax.random.split(key)

    B = 8
    # x_input = (a, x_n) pairs: a in [2.5, 4.0], x_n in (0, 1)
    a = jax.random.uniform(kx, (B, 1), jnp.float32, 2.5, 4.0)
    xn = jax.random.uniform(jax.random.fold_in(kx, 1), (B, 1), jnp.float32, 0.0, 1.0)
    x = jnp.concatenate([a, xn], axis=1)  # (B, 2)

    params = make_params(key)
    ref = reference_forward(x, params)

    # Default (bf16 matmul operands, f32 accumulation): loose tolerance.
    out = jax.block_until_ready(iterative_logistic_predictor(x, tuple(params)))
    assert out.shape == (B, 1), out.shape
    assert jnp.allclose(out, ref, atol=2e-2, rtol=2e-2), (out, ref)

    # f32 mode: exact parity with the reference.
    out_f32 = jax.block_until_ready(
        iterative_logistic_predictor(x, tuple(params), matmul_dtype=jnp.float32))
    assert jnp.allclose(out_f32, ref, atol=1e-5, rtol=1e-5), (out_f32, ref)

    # Multi-tile path (2 grid steps of 128 lanes each, with tail padding).
    B2 = 200
    x2 = jax.random.uniform(jax.random.fold_in(kx, 2), (B2, 2), jnp.float32, 0.0, 1.0)
    ref2 = reference_forward(x2, params)
    out2 = jax.block_until_ready(iterative_logistic_predictor(x2, tuple(params)))
    assert out2.shape == (B2, 1), out2.shape
    assert jnp.allclose(out2, ref2, atol=2e-2, rtol=2e-2)
    out2_f32 = jax.block_until_ready(
        iterative_logistic_predictor(x2, tuple(params), matmul_dtype=jnp.float32))
    assert jnp.allclose(out2_f32, ref2, atol=1e-5, rtol=1e-5)

    print("KERNEL_OK")
</pallas_src>

<mosaic_0001>
module attributes {stable_mosaic.version = 11 : i64} {
  func.func @mlp_kernel(%arg0: i32, %arg1: memref<2x8xf32, #tpu.memory_space<vmem>>, %arg2: memref<128x2xf32, #tpu.memory_space<vmem>>, %arg3: memref<128x1xf32, #tpu.memory_space<vmem>>, %arg4: memref<256x128xbf16, #tpu.memory_space<vmem>>, %arg5: memref<256x1xf32, #tpu.memory_space<vmem>>, %arg6: memref<128x256xbf16, #tpu.memory_space<vmem>>, %arg7: memref<128x1xf32, #tpu.memory_space<vmem>>, %arg8: memref<128x1xf32, #tpu.memory_space<vmem>>, %arg9: memref<1x1xf32, #tpu.memory_space<vmem>>, %arg10: memref<1x8xf32, #tpu.memory_space<vmem>>) attributes {dimension_semantics = [#tpu.dimension_semantics<parallel>], iteration_bounds = array<i64: 1>, scalar_prefetch = 0 : i64, scratch_operands = 0 : i64, tpu.core_type = #tpu.core_type<tc>, window_params = [{transform_indices = @transform_0, window_bounds = array<i64: 2, 8>}, {pipeline_mode = #tpu.pipeline_mode<synchronous>, transform_indices = @transform_1, window_bounds = array<i64: 128, 2>}, {pipeline_mode = #tpu.pipeline_mode<synchronous>, transform_indices = @transform_2, window_bounds = array<i64: 128, 1>}, {pipeline_mode = #tpu.pipeline_mode<synchronous>, transform_indices = @transform_3, window_bounds = array<i64: 256, 128>}, {pipeline_mode = #tpu.pipeline_mode<synchronous>, transform_indices = @transform_4, window_bounds = array<i64: 256, 1>}, {pipeline_mode = #tpu.pipeline_mode<synchronous>, transform_indices = @transform_5, window_bounds = array<i64: 128, 256>}, {pipeline_mode = #tpu.pipeline_mode<synchronous>, transform_indices = @transform_6, window_bounds = array<i64: 128, 1>}, {pipeline_mode = #tpu.pipeline_mode<synchronous>, transform_indices = @transform_7, window_bounds = array<i64: 128, 1>}, {pipeline_mode = #tpu.pipeline_mode<synchronous>, transform_indices = @transform_8, window_bounds = array<i64: 1, 1>}, {transform_indices = @transform_9, window_bounds = array<i64: 1, 8>}]} {
    %c0 = arith.constant 0 : index
    %c0_0 = arith.constant 0 : index
    %0 = vector.load %arg1[%c0, %c0_0] : memref<2x8xf32, #tpu.memory_space<vmem>>, vector<1x8xf32>
    %c1 = arith.constant 1 : index
    %c0_1 = arith.constant 0 : index
    %1 = vector.load %arg1[%c1, %c0_1] : memref<2x8xf32, #tpu.memory_space<vmem>>, vector<1x8xf32>
    %c0_2 = arith.constant 0 : index
    %c0_3 = arith.constant 0 : index
    %2 = vector.load %arg2[%c0_2, %c0_3] : memref<128x2xf32, #tpu.memory_space<vmem>>, vector<128x1xf32>
    %3 = vector.broadcast %2 : vector<128x1xf32> to vector<128x8xf32>
    %4 = vector.broadcast %0 : vector<1x8xf32> to vector<128x8xf32>
    %5 = arith.mulf %3, %4 : vector<128x8xf32>
    %c0_4 = arith.constant 0 : index
    %c1_5 = arith.constant 1 : index
    %6 = vector.load %arg2[%c0_4, %c1_5] : memref<128x2xf32, #tpu.memory_space<vmem>>, vector<128x1xf32>
    %7 = vector.broadcast %6 : vector<128x1xf32> to vector<128x8xf32>
    %8 = vector.broadcast %1 : vector<1x8xf32> to vector<128x8xf32>
    %9 = arith.mulf %7, %8 : vector<128x8xf32>
    %10 = arith.addf %5, %9 : vector<128x8xf32>
    %c0_6 = arith.constant 0 : index
    %c0_7 = arith.constant 0 : index
    %11 = vector.load %arg3[%c0_6, %c0_7] : memref<128x1xf32, #tpu.memory_space<vmem>>, vector<128x1xf32>
    %12 = vector.broadcast %11 : vector<128x1xf32> to vector<128x8xf32>
    %13 = arith.addf %10, %12 : vector<128x8xf32>
    %cst = arith.constant 0.000000e+00 : f32
    %14 = vector.broadcast %cst : f32 to vector<128x8xf32>
    %15 = arith.maximumf %13, %14 : vector<128x8xf32>
    %c0_8 = arith.constant 0 : index
    %c0_9 = arith.constant 0 : index
    %16 = vector.load %arg4[%c0_8, %c0_9] : memref<256x128xbf16, #tpu.memory_space<vmem>>, vector<256x128xbf16>
    %17 = arith.truncf %15 : vector<128x8xf32> to vector<128x8xbf16>
    %cst_10 = arith.constant dense<0.000000e+00> : vector<256x8xf32>
    %18 = tpu.matmul %16, %17, %cst_10 {dimension_numbers = #tpu.dot_dimension_numbers<[1], [0], [0], [1], [0, 0, 1, 1], [], []>} : vector<256x128xbf16>, vector<128x8xbf16>, vector<256x8xf32> -> vector<256x8xf32>
    %c0_11 = arith.constant 0 : index
    %c0_12 = arith.constant 0 : index
    %19 = vector.load %arg5[%c0_11, %c0_12] : memref<256x1xf32, #tpu.memory_space<vmem>>, vector<256x1xf32>
    %20 = vector.broadcast %19 : vector<256x1xf32> to vector<256x8xf32>
    %21 = arith.addf %18, %20 : vector<256x8xf32>
    %cst_13 = arith.constant 0.000000e+00 : f32
    %22 = vector.broadcast %cst_13 : f32 to vector<256x8xf32>
    %23 = arith.maximumf %21, %22 : vector<256x8xf32>
    %c0_14 = arith.constant 0 : index
    %c0_15 = arith.constant 0 : index
    %24 = vector.load %arg6[%c0_14, %c0_15] : memref<128x256xbf16, #tpu.memory_space<vmem>>, vector<128x256xbf16>
    %25 = arith.truncf %23 : vector<256x8xf32> to vector<256x8xbf16>
    %cst_16 = arith.constant dense<0.000000e+00> : vector<128x8xf32>
    %26 = tpu.matmul %24, %25, %cst_16 {dimension_numbers = #tpu.dot_dimension_numbers<[1], [0], [0], [1], [0, 0, 1, 1], [], []>} : vector<128x256xbf16>, vector<256x8xbf16>, vector<128x8xf32> -> vector<128x8xf32>
    %c0_17 = arith.constant 0 : index
    %c0_18 = arith.constant 0 : index
    %27 = vector.load %arg7[%c0_17, %c0_18] : memref<128x1xf32, #tpu.memory_space<vmem>>, vector<128x1xf32>
    %28 = vector.broadcast %27 : vector<128x1xf32> to vector<128x8xf32>
    %29 = arith.addf %26, %28 : vector<128x8xf32>
    %cst_19 = arith.constant 0.000000e+00 : f32
    %30 = vector.broadcast %cst_19 : f32 to vector<128x8xf32>
    %31 = arith.maximumf %29, %30 : vector<128x8xf32>
    %c0_20 = arith.constant 0 : index
    %c0_21 = arith.constant 0 : index
    %32 = vector.load %arg8[%c0_20, %c0_21] : memref<128x1xf32, #tpu.memory_space<vmem>>, vector<128x1xf32>
    %33 = vector.broadcast %32 : vector<128x1xf32> to vector<128x8xf32>
    %34 = arith.mulf %31, %33 : vector<128x8xf32>
    %cst_22 = arith.constant dense<0.000000e+00> : vector<8xf32>
    %35 = vector.multi_reduction <add>, %34, %cst_22 [0] : vector<128x8xf32> to vector<8xf32>
    %36 = vector.shape_cast %35 : vector<8xf32> to vector<1x8xf32>
    %c0_23 = arith.constant 0 : index
    %c0_24 = arith.constant 0 : index
    %37 = vector.load %arg9[%c0_23, %c0_24] : memref<1x1xf32, #tpu.memory_space<vmem>>, vector<1x1xf32>
    %38 = vector.broadcast %37 : vector<1x1xf32> to vector<1x8xf32>
    %39 = arith.addf %36, %38 : vector<1x8xf32>
    %40 = arith.negf %39 : vector<1x8xf32>
    %41 = math.exp %40 : vector<1x8xf32>
    %cst_25 = arith.constant 1.000000e+00 : f32
    %42 = vector.broadcast %cst_25 : f32 to vector<1x8xf32>
    %43 = arith.addf %42, %41 : vector<1x8xf32>
    %44 = arith.divf %42, %43 : vector<1x8xf32>
    %c0_26 = arith.constant 0 : index
    %c0_27 = arith.constant 0 : index
    %45 = vector.load %arg10[%c0_26, %c0_27] : memref<1x8xf32, #tpu.memory_space<vmem>>, vector<1x8xf32>
    tpu.vector_store %arg10[%c0_26, %c0_27], %44 {strides = array<i32>} : memref<1x8xf32, #tpu.memory_space<vmem>>, vector<1x8xf32>,
    return
  }
  func.func @transform_0(%arg0: i32) -> (i32, i32) {
    %c0_i32 = arith.constant 0 : i32
    %c0_i32_0 = arith.constant 0 : i32
    return %c0_i32, %arg0 : i32, i32
  }
  func.func @transform_1(%arg0: i32) -> (i32, i32) {
    %c0_i32 = arith.constant 0 : i32
    %c0_i32_0 = arith.constant 0 : i32
    %c0_i32_1 = arith.constant 0 : i32
    return %c0_i32, %c0_i32_0 : i32, i32
  }
  func.func @transform_2(%arg0: i32) -> (i32, i32) {
    %c0_i32 = arith.constant 0 : i32
    %c0_i32_0 = arith.constant 0 : i32
    %c0_i32_1 = arith.constant 0 : i32
    return %c0_i32, %c0_i32_0 : i32, i32
  }
  func.func @transform_3(%arg0: i32) -> (i32, i32) {
    %c0_i32 = arith.constant 0 : i32
    %c0_i32_0 = arith.constant 0 : i32
    %c0_i32_1 = arith.constant 0 : i32
    return %c0_i32, %c0_i32_0 : i32, i32
  }
  func.func @transform_4(%arg0: i32) -> (i32, i32) {
    %c0_i32 = arith.constant 0 : i32
    %c0_i32_0 = arith.constant 0 : i32
    %c0_i32_1 = arith.constant 0 : i32
    return %c0_i32, %c0_i32_0 : i32, i32
  }
  func.func @transform_5(%arg0: i32) -> (i32, i32) {
    %c0_i32 = arith.constant 0 : i32
    %c0_i32_0 = arith.constant 0 : i32
    %c0_i32_1 = arith.constant 0 : i32
    return %c0_i32, %c0_i32_0 : i32, i32
  }
  func.func @transform_6(%arg0: i32) -> (i32, i32) {
    %c0_i32 = arith.constant 0 : i32
    %c0_i32_0 = arith.constant 0 : i32
    %c0_i32_1 = arith.constant 0 : i32
    return %c0_i32, %c0_i32_0 : i32, i32
  }
  func.func @transform_7(%arg0: i32) -> (i32, i32) {
    %c0_i32 = arith.constant 0 : i32
    %c0_i32_0 = arith.constant 0 : i32
    %c0_i32_1 = arith.constant 0 : i32
    return %c0_i32, %c0_i32_0 : i32, i32
  }
  func.func @transform_8(%arg0: i32) -> (i32, i32) {
    %c0_i32 = arith.constant 0 : i32
    %c0_i32_0 = arith.constant 0 : i32
    %c0_i32_1 = arith.constant 0 : i32
    return %c0_i32, %c0_i32_0 : i32, i32
  }
  func.func @transform_9(%arg0: i32) -> (i32, i32) {
    %c0_i32 = arith.constant 0 : i32
    %c0_i32_0 = arith.constant 0 : i32
    return %c0_i32, %arg0 : i32, i32
  }
}

</mosaic_0001>

<bundles_post_ra>
// kernel: iterative_logistic_predictor.1
= control target key start
LH: loop header
LB: loop body
LE: loop exit
PB: predicated region body
PF: predicated region fallthrough
CT: control target
= control target key end

     0   :  { %s2327_s0 = inlined_call_operand.vmem [shape: f32[2,8], index: 0, kind: input, shape index: {}]   ;;  %s2328_s1 = inlined_call_operand.vmem [shape: f32[128,2], index: 1, kind: input, shape index: {}]   ;;  %s2329_s2 = inlined_call_operand.vmem [shape: f32[128,1], index: 2, kind: input, shape index: {}]   ;;  %s2330_s3 = inlined_call_operand.vmem [shape: bf16[256,128], index: 3, kind: input, shape index: {}]   ;;  %s2331_s4 = inlined_call_operand.vmem [shape: f32[256,1], index: 4, kind: input, shape index: {}]   ;;  %s2332_s5 = inlined_call_operand.vmem [shape: bf16[128,256], index: 5, kind: input, shape index: {}]   ;;  %s2333_s6 = inlined_call_operand.vmem [shape: f32[128,1], index: 6, kind: input, shape index: {}]   ;;  %s2334_s7 = inlined_call_operand.vmem [shape: f32[128,1], index: 7, kind: input, shape index: {}]   ;;  %s2335_s8 = inlined_call_operand.<no memory space> [shape: f32[1,1], index: 8, kind: input, shape index: {}]   ;;  %s2336_s9 = inlined_call_operand.hbm [shape: f32[1,8], index: 9, kind: output, shape index: {}]  }
   0x1   :  { %v14_v0 = vstv %s2335_s8 }
   0x2   :  { %15 = vst [vmem:[#allocation2] sm:$0x1] %v14_v0 }
   0x3   :  { %v52_v1 = vld [vmem:[%s2328_s1 + $0x70] sm:$0xff]  ;;  %v50_v2 = vld [vmem:[%s2328_s1 + $0x60] sm:$0xff]  ;;  %v1665_v3 = vmov 1   ;;  %v53_v4 = vld [vmem:[%s2328_s1 + $0x78] sm:$0xff]  ;;  %v1666_v8 = vmov 0  }
   0x4   :  { %1583 = vset.pattern.permute.xlu0 %v1665_v3  ;;  %1581 = vset.pattern.permute.xlu1 %v1665_v3  ;;  %v48_v5 = vld [vmem:[%s2328_s1 + $0x50] sm:$0xff]  ;;  %v46_v6 = vld [vmem:[%s2328_s1 + $0x40] sm:$0xff]  ;;  %v51_v7 = vld [vmem:[%s2328_s1 + $0x68] sm:$0xff] }
   0x5   :  { %211 = vperm.xlu1 %1581, %v52_v1   ;;  %203 = vperm.xlu0 %1583, %v50_v2   ;;  %v44_v9 = vld [vmem:[%s2328_s1 + $0x30] sm:$0xff]  ;;  %v42_v10 = vld [vmem:[%s2328_s1 + $0x20] sm:$0xff]  ;;  %v49_v14 = vld [vmem:[%s2328_s1 + $0x58] sm:$0xff] }
   0x6   :  { %v268_v11 = vld [vmem:[%s2329_s2 + $0x70] sm:$0xff]  ;;  %v1762_v13 = vld [vmem:[%s2328_s1] sm:$0xff] }
   0x7   :  { %v1755_v12 = vld [vmem:[%s2328_s1 + $0x10] sm:$0xff]  ;;  %v266_v15 = vld [vmem:[%s2329_s2 + $0x60] sm:$0xff] }
   0x9   :  { %215 = vperm.xlu1 %1581, %v53_v4   ;;  %195 = vperm.xlu0 %1583, %v48_v5  }
   0xd   :  { %1582 = vset.pattern.permute.xlu1 %v1666_v8  ;;  %187 = vperm.xlu0 %1583, %v46_v6  }
   0xe   :  { %121 = vperm.xlu1 %1582, %v51_v7  }
  0x11   :  { %179 = vperm.xlu0 %1583, %v44_v9  }
  0x12   :  { %1584 = vset.pattern.permute.xlu1 %v1665_v3 }
  0x13   :  { %207 = vperm.xlu1 %1584, %v51_v7  }
  0x15   :  { %171 = vperm.xlu0 %1583, %v42_v10  }
  0x17   :  { %1585 = vset.pattern.permute.xlu1 %v1666_v8 }
  0x18   :  { %342 = vperm.xlu1 %1585, %v268_v11  }
  0x19   :  { %163 = vperm.xlu0 %1583, %v1755_v12  }
  0x1c   :  { %106 = vperm.xlu1 %1585, %v48_v5  }
  0x1d   :  { %155 = vperm.xlu0 %1583, %v1762_v13  }
  0x20   :  { %111 = vperm.xlu1 %1585, %v49_v14  }
  0x21   :  { %1596 = vset.pattern.permute.xlu0 %v1666_v8 }
  0x22   :  { %126 = vperm.xlu0 %1596, %v52_v1  }
  0x24   :  { %1586 = vset.pattern.permute.xlu1 %v1665_v3 }
  0x25   :  { %199 = vperm.xlu1 %1586, %v49_v14  }
  0x26   :  { %131 = vperm.xlu0 %1596, %v53_v4  }
  0x27   :  { %16 = vsyncpa [#allocation4], 0  ;;  %v269_v16 = vld [vmem:[%s2329_s2 + $0x78] sm:$0xff]  ;;  %v47_v17 = vld [vmem:[%s2328_s1 + $0x48] sm:$0xff]  ;;  %vm1336_vm0 = vcmask 64512   ;;  %vm1391_vm1 = vcmask 57344  }
  0x28   :  { %v267_v18 = vld [vmem:[%s2329_s2 + $0x68] sm:$0xff]  ;;  %v265_v19 = vld [vmem:[%s2329_s2 + $0x58] sm:$0xff]  ;;  %v264_v21 = vld [vmem:[%s2329_s2 + $0x50] sm:$0xff] }
  0x29   :  { %1587 = vset.pattern.permute.xlu1 %v1666_v8  ;;  %v263_v20 = vld [vmem:[%s2329_s2 + $0x48] sm:$0xff]  ;;  %v261_v22 = vld [vmem:[%s2329_s2 + $0x38] sm:$0xff]  ;;  %v452_v26 = vld [vmem:[%s2331_s4 + $0xf0] sm:$0xff] }
  0x2a   :  { %332 = vperm.xlu1 %1587, %v266_v15   ;;  %116 = vperm.xlu0 %1596, %v50_v2   ;;  %v259_v23 = vld [vmem:[%s2329_s2 + $0x28] sm:$0xff]  ;;  %v45_v24 = vld [vmem:[%s2328_s1 + $0x38] sm:$0xff]  ;;  %v262_v27 = vld [vmem:[%s2329_s2 + $0x40] sm:$0xff] }
  0x2b   :  { %v257_v25 = vld [vmem:[%s2329_s2 + $0x18] sm:$0xff]  ;;  %v436_v28 = vld [vmem:[%s2331_s4 + $0x70] sm:$0xff]  ;;  %v450_v29 = vld [vmem:[%s2331_s4 + $0xe0] sm:$0xff] }
  0x2c   :  { %v43_v30 = vld [vmem:[%s2328_s1 + $0x28] sm:$0xff]  ;;  %v434_v31 = vld [vmem:[%s2331_s4 + $0x60] sm:$0xff]  ;;  %v448_v32 = vld [vmem:[%s2331_s4 + $0xd0] sm:$0xff] }
  0x2d   :  { %v432_v33 = vld [vmem:[%s2331_s4 + $0x50] sm:$0xff]  ;;  %v446_v35 = vld [vmem:[%s2331_s4 + $0xc0] sm:$0xff]  ;;  %v41_v37 = vld [vmem:[%s2328_s1 + $0x18] sm:$0xff] }
  0x2e   :  { %96 = vperm.xlu1 %1587, %v46_v6   ;;  %347 = vperm.xlu0 %1596, %v269_v16   ;;  %v260_v34 = vld [vmem:[%s2329_s2 + $0x30] sm:$0xff]  ;;  %v430_v36 = vld [vmem:[%s2331_s4 + $0x40] sm:$0xff]  ;;  %v39_v44 = vld [vmem:[%s2328_s1 + $0x8] sm:$0xff] }
  0x2f   :  { %v444_v38 = vld [vmem:[%s2331_s4 + $0xb0] sm:$0xff]  ;;  %v258_v40 = vld [vmem:[%s2329_s2 + $0x20] sm:$0xff]  ;;  %v255_v57 = vld [vmem:[%s2329_s2 + $0x8] sm:$0xff] }
  0x30   :  { %v428_v39 = vld [vmem:[%s2331_s4 + $0x30] sm:$0xff]  ;;  %v442_v41 = vld [vmem:[%s2331_s4 + $0xa0] sm:$0xff]  ;;  %v453_v60 = vld [vmem:[%s2331_s4 + $0xf8] sm:$0xff] }
  0x31   :  { %v426_v42 = vld [vmem:[%s2331_s4 + $0x20] sm:$0xff]  ;;  %v440_v43 = vld [vmem:[%s2331_s4 + $0x90] sm:$0xff]  ;;  %v437_v1 = vld [vmem:[%s2331_s4 + $0x78] sm:$0xff] }
  0x32   :  { %101 = vperm.xlu1 %1587, %v47_v17   ;;  %337 = vperm.xlu0 %1596, %v267_v18   ;;  %v424_v45 = vld [vmem:[%s2331_s4 + $0x10] sm:$0xff]  ;;  %v438_v46 = vld [vmem:[%s2331_s4 + $0x80] sm:$0xff]  ;;  %v451_v5 = vld [vmem:[%s2331_s4 + $0xe8] sm:$0xff] }
  0x33   :  { %v256_v49 = vld [vmem:[%s2329_s2 + $0x10] sm:$0xff]  ;;  %v422_v50 = vld [vmem:[%s2331_s4] sm:$0xff]  ;;  %v940_v7 = vld [vmem:[%s2333_s6 + $0x28] sm:$0xff] }
  0x34   :  { %v254_v53 = vld [vmem:[%s2329_s2] sm:$0xff]  ;;  %v937_v58 = vld [vmem:[%s2333_s6 + $0x10] sm:$0xff]  ;;  %v942_v16 = vld [vmem:[%s2333_s6 + $0x38] sm:$0xff] }
  0x35   :  { %v935_v54 = vld [vmem:[%s2333_s6] sm:$0xff]  ;;  %v941_v11 = vld [vmem:[%s2333_s6 + $0x30] sm:$0xff] }
  0x36   :  { %1588 = vset.pattern.permute.xlu1 %v1665_v3  ;;  %327 = vperm.xlu0 %1596, %v265_v19   ;;  %v1224_v62 = vld [vmem:[%s2334_s7] sm:$0xff] }
  0x37   :  { %191 = vperm.xlu1 %1588, %v47_v17   ;;  %v1599_v63 = vld [vmem:[%s2330_s3] sm:$0xff]  }
  0x38   :  { %1546 = vmatprep.mubr.bf16.mxu0 %v1599_v63  ;;  %v1946_v14 = vld [vmem:[%s2327_s0 + $0x1] ss:$0 sm:$0xff]  ;;  %v1951_v15 = vld [vmem:[%s2327_s0] ss:$0 sm:$0xff] }
  0x3a   :  { %317 = vperm.xlu0 %1596, %v263_v20   ;;  %v433_v20 = vld [vmem:[%s2331_s4 + $0x58] sm:$0xff] }
  0x3b   :  { %1589 = vset.pattern.permute.xlu1 %v1666_v8 }
  0x3c   :  { %322 = vperm.xlu1 %1589, %v264_v21  }
  0x3e   :  { %307 = vperm.xlu0 %1596, %v261_v22   ;;  %v943_v22 = vld [vmem:[%s2333_s6 + $0x40] sm:$0xff] }
  0x40   :  { %86 = vperm.xlu1 %1589, %v44_v9   ;;  %v435_v9 = vld [vmem:[%s2331_s4 + $0x68] sm:$0xff] }
  0x42   :  { %297 = vperm.xlu0 %1596, %v259_v23  }
  0x44   :  { %91 = vperm.xlu1 %1589, %v45_v24  }
  0x46   :  { %287 = vperm.xlu0 %1596, %v257_v25  }
  0x48   :  { %1590 = vset.pattern.permute.xlu1 %v1665_v3 }
  0x49   :  { %183 = vperm.xlu1 %1590, %v45_v24  }
  0x4a   :  { %606 = vperm.xlu0 %1596, %v452_v26  }
  0x4d   :  { %1591 = vset.pattern.permute.xlu1 %v1666_v8 }
  0x4e   :  { %312 = vperm.xlu1 %1591, %v262_v27   ;;  %526 = vperm.xlu0 %1596, %v436_v28   ;;  %v447_v28 = vld [vmem:[%s2331_s4 + $0xc8] sm:$0xff] }
  0x52   :  { %76 = vperm.xlu1 %1591, %v42_v10   ;;  %596 = vperm.xlu0 %1596, %v450_v29  }
  0x56   :  { %81 = vperm.xlu1 %1591, %v43_v30   ;;  %516 = vperm.xlu0 %1596, %v434_v31   ;;  %v944_v31 = vld [vmem:[%s2333_s6 + $0x48] sm:$0xff] }
  0x5a   :  { %1592 = vset.pattern.permute.xlu1 %v1665_v3  ;;  %586 = vperm.xlu0 %1596, %v448_v32  }
  0x5b   :  { %175 = vperm.xlu1 %1592, %v43_v30  }
  0x5e   :  { %506 = vperm.xlu0 %1596, %v432_v33  }
  0x5f   :  { %1593 = vset.pattern.permute.xlu1 %v1666_v8 }
  0x60   :  { %302 = vperm.xlu1 %1593, %v260_v34  }
  0x62   :  { %576 = vperm.xlu0 %1596, %v446_v35  }
  0x64   :  { %66 = vperm.xlu1 %1593, %v1755_v12  }
  0x66   :  { %496 = vperm.xlu0 %1596, %v430_v36  }
  0x68   :  { %71 = vperm.xlu1 %1593, %v41_v37  }
  0x6a   :  { %566 = vperm.xlu0 %1596, %v444_v38   ;;  %v431_v38 = vld [vmem:[%s2331_s4 + $0x48] sm:$0xff] }
  0x6c   :  { %1594 = vset.pattern.permute.xlu1 %v1665_v3 }
  0x6d   :  { %167 = vperm.xlu1 %1594, %v41_v37  }
  0x6e   :  { %486 = vperm.xlu0 %1596, %v428_v39  }
  0x71   :  { %1595 = vset.pattern.permute.xlu1 %v1666_v8 }
  0x72   :  { %292 = vperm.xlu1 %1595, %v258_v40   ;;  %556 = vperm.xlu0 %1596, %v442_v41   ;;  %v945_v41 = vld [vmem:[%s2333_s6 + $0x50] sm:$0xff] }
  0x76   :  { %476 = vperm.xlu0 %1596, %v426_v42   ;;  %56 = vperm.xlu1 %1595, %v1762_v13   ;;  %v449_v13 = vld [vmem:[%s2331_s4 + $0xd8] sm:$0xff] }
  0x7a   :  { %546 = vperm.xlu0 %1596, %v440_v43   ;;  %61 = vperm.xlu1 %1595, %v39_v44  }
  0x7e   :  { %466 = vperm.xlu0 %1596, %v424_v45   ;;  %1597 = vset.pattern.permute.xlu1 %v1665_v3  ;;  %v939_v3 = vld [vmem:[%s2333_s6 + $0x20] sm:$0xff] }
  0x7f   :  { %159 = vperm.xlu1 %1597, %v39_v44  }
  0x80   :  { %v212_v47 = vpop.permute.xlu1 %211  ;;  %v204_v48 = vpop.permute.xlu0 %203 }
  0x81   :  { %v236_v21 = vmul.f32 %v1946_v14, %v212_v47  ;;  %v234_v23 = vmul.f32 %v1946_v14, %v204_v48  ;;  %v445_v48 = vld [vmem:[%s2331_s4 + $0xb8] sm:$0xff] }
  0x82   :  { %536 = vperm.xlu0 %1596, %v438_v46  }
  0x83   :  { %1598 = vset.pattern.permute.xlu1 %v1666_v8 }
  0x84   :  { %v216_v51 = vpop.permute.xlu1 %215  ;;  %282 = vperm.xlu1 %1598, %v256_v49   ;;  %v1885_v52 = vpop.permute.xlu0 %195 }
  0x85   :  { %v237_v29 = vmul.f32 %v1946_v14, %v216_v51  ;;  %v946_v51 = vld [vmem:[%s2333_s6 + $0x58] sm:$0xff] }
  0x86   :  { %456 = vperm.xlu0 %1596, %v422_v50  }
  0x88   :  { %272 = vperm.xlu1 %1598, %v254_v53   ;;  %v1893_v55 = vpop.permute.xlu0 %187 }
  0x89   :  { %v1895_v56 = vpop.permute.xlu1 %121 }
  0x8a   :  { %953 = vperm.xlu0 %1596, %v935_v54   ;;  %v151_v39 = vmul.f32 %v1951_v15, %v1895_v56 }
  0x8c   :  { %277 = vperm.xlu1 %1598, %v255_v57   ;;  %v1903_v59 = vpop.permute.xlu0 %179  ;;  %v429_v57 = vld [vmem:[%s2331_s4 + $0x38] sm:$0xff] }
  0x8e   :  { %v208_v61 = vpop.permute.xlu1 %207  ;;  %963 = vperm.xlu0 %1596, %v937_v58   ;;  %v232_v58 = vmul.f32 %v1946_v14, %v1885_v52  ;;  %v443_v52 = vld [vmem:[%s2331_s4 + $0xa8] sm:$0xff] }
  0x8f   :  { %v235_v32 = vmul.f32 %v1946_v14, %v208_v61 }
  0x90   :  { %611 = vperm.xlu1 %1598, %v453_v60   ;;  %v1914_v0 = vpop.permute.xlu0 %171 }
  0x91   :  { %v251_v44 = vadd.f32 %v235_v32, %v151_v39  ;;  %v1374_v32 = vld [vmem:[#allocation2] sm:$0x1] }
  0x92   :  { %1242 = vperm.xlu0 %1596, %v1224_v62  }
  0x93   :  { %v343_v2 = vpop.permute.xlu1 %342 }
  0x94   :  { %531 = vperm.xlu1 %1598, %v437_v1   ;;  %v1922_v4 = vpop.permute.xlu0 %163 }
  0x96   :  { %973 = vperm.xlu0 %1596, %v939_v3  }
  0x97   :  { %v1927_v6 = vpop.permute.xlu1 %106 }
  0x98   :  { %601 = vperm.xlu1 %1598, %v451_v5   ;;  %v1932_v8 = vpop.permute.xlu0 %155  ;;  %v148_v60 = vmul.f32 %v1951_v15, %v1927_v6 }
  0x9a   :  { %978 = vperm.xlu0 %1596, %v940_v7   ;;  %v248_v6 = vadd.f32 %v232_v58, %v148_v60  ;;  %v1227_v60 = vld [vmem:[%s2334_s7 + $0x18] sm:$0xff] }
  0x9b   :  { %v112_v10 = vpop.permute.xlu1 %111 }
  0x9c   :  { %521 = vperm.xlu1 %1598, %v435_v9   ;;  %v149_v61 = vmul.f32 %v1951_v15, %v112_v10  ;;  %v948_v9 = vld [vmem:[%s2333_s6 + $0x68] sm:$0xff] }
  0x9d   :  { %v127_v12 = vpop.permute.xlu0 %126 }
  0x9e   :  { %983 = vperm.xlu0 %1596, %v941_v11   ;;  %v152_v17 = vmul.f32 %v1951_v15, %v127_v12  ;;  %v427_v11 = vld [vmem:[%s2331_s4 + $0x28] sm:$0xff] }
  0xa0   :  { %v200_v18 = vpop.permute.xlu1 %199  ;;  %591 = vperm.xlu1 %1598, %v449_v13   ;;  %v252_v24 = vadd.f32 %v236_v21, %v152_v17  ;;  %v949_v17 = vld [vmem:[%s2333_s6 + $0x70] sm:$0xff]  ;;  %v950_v21 = vld [vmem:[%s2333_s6 + $0x78] sm:$0xff] }
  0xa1   :  { %v132_v19 = vpop.permute.xlu0 %131  ;;  %v233_v53 = vmul.f32 %v1946_v14, %v200_v18 }
  0xa2   :  { %988 = vperm.xlu0 %1596, %v942_v16   ;;  %v153_v25 = vmul.f32 %v1951_v15, %v132_v19  ;;  %v364_v35 = vadd.f32 %v343_v2, %v252_v24  ;;  %v947_v2 = vld [vmem:[%s2333_s6 + $0x60] sm:$0xff]  ;;  %v441_v19 = vld [vmem:[%s2331_s4 + $0x98] sm:$0xff] }
  0xa3   :  { %v249_v3 = vadd.f32 %v233_v53, %v149_v61  ;;  %v1226_v53 = vld [vmem:[%s2334_s7 + $0x10] sm:$0xff] }
  0xa4   :  { %511 = vperm.xlu1 %1598, %v433_v20   ;;  %v253_v34 = vadd.f32 %v237_v29, %v153_v25  ;;  %v380_v45 = vmax.f32 %v364_v35, 0.0  ;;  %v1238_v25 = vld [vmem:[%s2334_s7 + $0x70] sm:$0xff] }
  0xa5   :  { %v333_v26 = vpop.permute.xlu1 %332  ;;  %v117_v27 = vpop.permute.xlu0 %116 }
  0xa6   :  { %v150_v30 = vmul.f32 %v1951_v15, %v117_v27  ;;  %993 = vperm.xlu0 %1596, %v943_v22  }
  0xa8   :  { %v250_v33 = vadd.f32 %v234_v23, %v150_v30  ;;  %581 = vperm.xlu1 %1598, %v447_v28   ;;  %v425_v23 = vld [vmem:[%s2331_s4 + $0x18] sm:$0xff] }
  0xa9   :  { %v1975_v36 = vpop.permute.xlu1 %96  ;;  %v348_v37 = vpop.permute.xlu0 %347 }
  0xaa   :  { %v365_v40 = vadd.f32 %v348_v37, %v253_v34  ;;  %998 = vperm.xlu0 %1596, %v944_v31   ;;  %v362_v42 = vadd.f32 %v333_v26, %v250_v33  ;;  %v230_v26 = vmul.f32 %v1946_v14, %v1893_v55  ;;  %v146_v27 = vmul.f32 %v1951_v15, %v1975_v36  ;;  %v439_v31 = vld [vmem:[%s2331_s4 + $0x88] sm:$0xff] }
  0xab   :  { %v423_v55 = vld [vmem:[%s2331_s4 + $0x8] sm:$0xff] }
  0xac   :  { %v381_v43 = vmax.f32 %v365_v40, 0.0  ;;  %501 = vperm.xlu1 %1598, %v431_v38   ;;  %v378_v54 = vmax.f32 %v362_v42, 0.0  ;;  %v246_v34 = vadd.f32 %v230_v26, %v146_v27  ;;  %v936_v40 = vld [vmem:[%s2333_s6 + $0x8] sm:$0xff] }
  0xad   :  { %v102_v46 = vpop.permute.xlu1 %101  ;;  %v338_v47 = vpop.permute.xlu0 %337 }
  0xae   :  { %v363_v49 = vadd.f32 %v338_v47, %v251_v44  ;;  %1003 = vperm.xlu0 %1596, %v945_v41   ;;  %v421_v50 = vpack.c.bf16 %v381_v43, %v380_v45  ;;  %v147_v24 = vmul.f32 %v1951_v15, %v102_v46  ;;  %v938_v43 = vld [vmem:[%s2333_s6 + $0x18] sm:$0xff]  ;;  %v1225_v46 = vld [vmem:[%s2334_s7 + $0x8] sm:$0xff]  ;;  %v228_v47 = vmul.f32 %v1946_v14, %v1903_v59 }
  0xb0   :  { %v379_v56 = vmax.f32 %v363_v49, 0.0  ;;  %571 = vperm.xlu1 %1598, %v445_v48   ;;  %1530 = vmatprep.subr.bf16.mxu0 %v421_v50 }
  0xb1   :  { %1531 = vmatpush3.bf16.msra.mxu0 %v421_v50  ;;  %v328_v1 = vpop.permute.xlu0 %327 }
  0xb2   :  { %v420_v62 = vpack.c.bf16 %v379_v56, %v378_v54  ;;  %v192_v63 = vpop.permute.xlu1 %191  ;;  %1008 = vperm.xlu0 %1596, %v946_v51   ;;  %v361_v5 = vadd.f32 %v328_v1, %v249_v3  ;;  %v1228_v1 = vld [vmem:[%s2334_s7 + $0x20] sm:$0xff] }
  0xb3   :  { %v231_v22 = vmul.f32 %v1946_v14, %v192_v63 }
  0xb4   :  { %491 = vperm.xlu1 %1598, %v429_v57   ;;  %1532 = vmatprep.subr.bf16.mxu0 %v420_v62  ;;  %v377_v12 = vmax.f32 %v361_v5, 0.0 }
  0xb5   :  { %1533 = vmatpush3.bf16.msra.mxu0 %v420_v62  ;;  %v247_v28 = vadd.f32 %v231_v22, %v147_v24  ;;  %v318_v30 = vpop.permute.xlu0 %317 }
  0xb6   :  { %1013 = vperm.xlu0 %1596, %v947_v2  }
  0xb7   :  { %v323_v7 = vpop.permute.xlu1 %322  ;;  %v359_v33 = vadd.f32 %v318_v30, %v247_v28  ;;  %v1234_v28 = vld [vmem:[%s2334_s7 + $0x50] sm:$0xff] }
  0xb8   :  { %v360_v10 = vadd.f32 %v323_v7, %v248_v6  ;;  %561 = vperm.xlu1 %1598, %v443_v52   ;;  %v1229_v52 = vld [vmem:[%s2334_s7 + $0x28] sm:$0xff] }
  0xb9   :  { %v375_v36 = vmax.f32 %v359_v33, 0.0  ;;  %v308_v51 = vpop.permute.xlu0 %307 }
  0xba   :  { %v376_v13 = vmax.f32 %v360_v10, 0.0  ;;  %1018 = vperm.xlu0 %1596, %v948_v9   ;;  %v1230_v10 = vld [vmem:[%s2334_s7 + $0x30] sm:$0xff] }
  0xbb   :  { %v87_v16 = vpop.permute.xlu1 %86 }
  0xbc   :  { %481 = vperm.xlu1 %1598, %v427_v11   ;;  %v419_v18 = vpack.c.bf16 %v377_v12, %v376_v13  ;;  %v144_v48 = vmul.f32 %v1951_v15, %v87_v16  ;;  %v226_v11 = vmul.f32 %v1946_v14, %v1914_v0 }
  0xbd   :  { %v298_v12 = vpop.permute.xlu0 %297 }
  0xbe   :  { %1023 = vperm.xlu0 %1596, %v949_v17   ;;  %1534 = vmatprep.subr.bf16.mxu0 %v419_v18  ;;  %v244_v56 = vadd.f32 %v228_v47, %v144_v48  ;;  %v1237_v47 = vld [vmem:[%s2334_s7 + $0x68] sm:$0xff] }
  0xbf   :  { %v92_v20 = vpop.permute.xlu1 %91  ;;  %1535 = vmatpush3.bf16.msra.mxu0 %v419_v18  ;;  %v1231_v18 = vld [vmem:[%s2334_s7 + $0x38] sm:$0xff] }
  0xc0   :  { %551 = vperm.xlu1 %1598, %v441_v19   ;;  %v145_v45 = vmul.f32 %v1951_v15, %v92_v20 }
  0xc1   :  { %v288_v33 = vpop.permute.xlu0 %287 }
  0xc2   :  { %1028 = vperm.xlu0 %1596, %v950_v21  }
  0xc4   :  { %v184_v29 = vpop.permute.xlu1 %183  ;;  %471 = vperm.xlu1 %1598, %v425_v23   ;;  %v1232_v23 = vld [vmem:[%s2334_s7 + $0x40] sm:$0xff] }
  0xc5   :  { %v229_v44 = vmul.f32 %v1946_v14, %v184_v29 }
  0xc6   :  { %1312 = vperm.xlu0 %1596, %v1238_v25   ;;  %v1233_v25 = vld [vmem:[%s2334_s7 + $0x48] sm:$0xff] }
  0xc7   :  { %v245_v49 = vadd.f32 %v229_v44, %v145_v45 }
  0xc8   :  { %541 = vperm.xlu1 %1598, %v439_v31  }
  0xc9   :  { %v313_v35 = vpop.permute.xlu1 %312  ;;  %v357_v54 = vadd.f32 %v308_v51, %v245_v49 }
  0xca   :  { %v358_v37 = vadd.f32 %v313_v35, %v246_v34  ;;  %1377 = vperm.xlu0 %1596, %v1374_v32   ;;  %v224_v32 = vmul.f32 %v1946_v14, %v1922_v4  ;;  %v1235_v34 = vld [vmem:[%s2334_s7 + $0x58] sm:$0xff]  ;;  %v222_v4 = vmul.f32 %v1946_v14, %v1932_v8 }
  0xcb   :  { %v373_v61 = vmax.f32 %v357_v54, 0.0  ;;  %v1600_v54 = vld [vmem:[%s2330_s3 + $0x8] sm:$0xff]  }
  0xcc   :  { %v374_v38 = vmax.f32 %v358_v37, 0.0  ;;  %461 = vperm.xlu1 %1598, %v423_v55  }
  0xcd   :  { %v77_v39 = vpop.permute.xlu1 %76 }
  0xce   :  { %v418_v41 = vpack.c.bf16 %v375_v36, %v374_v38  ;;  %v142_v6 = vmul.f32 %v1951_v15, %v77_v39  ;;  %v1236_v39 = vld [vmem:[%s2334_s7 + $0x60] sm:$0xff] }
  0xd0   :  { %958 = vperm.xlu1 %1598, %v936_v40   ;;  %1536 = vmatprep.subr.bf16.mxu0 %v418_v41  ;;  %v242_v16 = vadd.f32 %v226_v11, %v142_v6  ;;  %v1614_v6 = vld [vmem:[%s2330_s3 + $0x78] sm:$0xff]  }
  0xd1   :  { %v82_v42 = vpop.permute.xlu1 %81  ;;  %1537 = vmatpush3.bf16.msra.mxu0 %v418_v41 }
  0xd2   :  { %v143_v5 = vmul.f32 %v1951_v15, %v82_v42 }
  0xd4   :  { %968 = vperm.xlu1 %1598, %v938_v43  }
  0xd6   :  { %v176_v50 = vpop.permute.xlu1 %175 }
  0xd7   :  { %v227_v3 = vmul.f32 %v1946_v14, %v176_v50 }
  0xd8   :  { %1247 = vperm.xlu1 %1598, %v1225_v46  }
  0xd9   :  { %v243_v7 = vadd.f32 %v227_v3, %v143_v5  ;;  %v1611_v3 = vld [vmem:[%s2330_s3 + $0x60] sm:$0xff]   ;;  %v1613_v5 = vld [vmem:[%s2330_s3 + $0x70] sm:$0xff]  }
  0xdb   :  { %v303_v57 = vpop.permute.xlu1 %302  ;;  %v355_v13 = vadd.f32 %v298_v12, %v243_v7  ;;  %v2152_v7 = vpop.permute.xlu0 %606 }
  0xdc   :  { %v356_v58 = vadd.f32 %v303_v57, %v244_v56  ;;  %1252 = vperm.xlu1 %1598, %v1226_v53   ;;  %v1601_v56 = vld [vmem:[%s2330_s3 + $0x10] sm:$0xff]   ;;  %v1602_v57 = vld [vmem:[%s2330_s3 + $0x18] sm:$0xff]  }
  0xdd   :  { %v371_v21 = vmax.f32 %v355_v13, 0.0 }
  0xde   :  { %v372_v59 = vmax.f32 %v356_v58, 0.0  ;;  %v1603_v58 = vld [vmem:[%s2330_s3 + $0x20] sm:$0xff]  }
  0xdf   :  { %v67_v62 = vpop.permute.xlu1 %66 }
  0xe0   :  { %v417_v63 = vpack.c.bf16 %v373_v61, %v372_v59  ;;  %1257 = vperm.xlu1 %1598, %v1227_v60   ;;  %v140_v29 = vmul.f32 %v1951_v15, %v67_v62  ;;  %v1604_v60 = vld [vmem:[%s2330_s3 + $0x28] sm:$0xff]   ;;  %v1605_v59 = vld [vmem:[%s2330_s3 + $0x30] sm:$0xff]   ;;  %v1606_v61 = vld [vmem:[%s2330_s3 + $0x38] sm:$0xff]  }
  0xe1   :  { %v1607_v62 = vld [vmem:[%s2330_s3 + $0x40] sm:$0xff]  }
  0xe2   :  { %1538 = vmatprep.subr.bf16.mxu0 %v417_v63  ;;  %v240_v55 = vadd.f32 %v224_v32, %v140_v29 }
  0xe3   :  { %v72_v2 = vpop.permute.xlu1 %71  ;;  %1539 = vmatpush3.bf16.msra.mxu0 %v417_v63  ;;  %v1608_v63 = vld [vmem:[%s2330_s3 + $0x48] sm:$0xff]  }
  0xe4   :  { %1262 = vperm.xlu1 %1598, %v1228_v1   ;;  %v141_v27 = vmul.f32 %v1951_v15, %v72_v2  ;;  %v1609_v1 = vld [vmem:[%s2330_s3 + $0x50] sm:$0xff]   ;;  %v1610_v2 = vld [vmem:[%s2330_s3 + $0x58] sm:$0xff]  }
  0xe8   :  { %v168_v9 = vpop.permute.xlu1 %167  ;;  %1267 = vperm.xlu1 %1598, %v1229_v52   ;;  %v1612_v52 = vld [vmem:[%s2330_s3 + $0x68] sm:$0xff]  }
  0xe9   :  { %v225_v26 = vmul.f32 %v1946_v14, %v168_v9 }
  0xeb   :  { %v241_v30 = vadd.f32 %v225_v26, %v141_v27 }
  0xec   :  { %1272 = vperm.xlu1 %1598, %v1230_v10   ;;  %v2156_v10 = vpop.permute.xlu0 %526 }
  0xed   :  { %v293_v17 = vpop.permute.xlu1 %292  ;;  %v353_v35 = vadd.f32 %v288_v33, %v241_v30 }
  0xee   :  { %v354_v19 = vadd.f32 %v293_v17, %v242_v16 }
  0xef   :  { %v369_v42 = vmax.f32 %v353_v35, 0.0 }
  0xf0   :  { %v370_v20 = vmax.f32 %v354_v19, 0.0  ;;  %1277 = vperm.xlu1 %1598, %v1231_v18   ;;  %v2160_v12 = vpop.permute.xlu0 %596 }
  0xf1   :  { %v57_v22 = vpop.permute.xlu1 %56 }
  0xf2   :  { %v416_v24 = vpack.c.bf16 %v371_v21, %v370_v20  ;;  %v138_v36 = vmul.f32 %v1951_v15, %v57_v22 }
  0xf4   :  { %1282 = vperm.xlu1 %1598, %v1232_v23   ;;  %1540 = vmatprep.subr.bf16.mxu0 %v416_v24  ;;  %v238_v46 = vadd.f32 %v222_v4, %v138_v36  ;;  %v2164_v16 = vpop.permute.xlu0 %516 }
  0xf5   :  { %v62_v0 = vpop.permute.xlu1 %61  ;;  %1541 = vmatpush3.bf16.msra.mxu0 %v416_v24 }
  0xf6   :  { %v139_v44 = vmul.f32 %v1951_v15, %v62_v0 }
  0xf8   :  { %1287 = vperm.xlu1 %1598, %v1233_v25   ;;  %v2168_v18 = vpop.permute.xlu0 %586 }
  0xfa   :  { %v160_v31 = vpop.permute.xlu1 %159 }
  0xfb   :  { %v223_v40 = vmul.f32 %v1946_v14, %v160_v31  ;;  %v1239_v14 = vld [vmem:[%s2334_s7 + $0x78] sm:$0xff] }
  0xfc   :  { %1292 = vperm.xlu1 %1598, %v1234_v28   ;;  %v2172_v20 = vpop.permute.xlu0 %506  ;;  %v1617_v28 = vld [vmem:[%s2332_s5 + $0x4] ss:$8 sps:$4 sm:$0xff]  }
  0xfd   :  { %v239_v49 = vadd.f32 %v223_v40, %v139_v44  ;;  %1143 = vmatprep.mubr.bf16.mxu1 %v1617_v28 }
  0xff   :  { %v283_v37 = vpop.permute.xlu1 %282 }
 0x100   :  { %v352_v38 = vadd.f32 %v283_v37, %v240_v55  ;;  %1297 = vperm.xlu1 %1598, %v1235_v34   ;;  %v2176_v22 = vpop.permute.xlu0 %576 }
 0x102   :  { %v368_v41 = vmax.f32 %v352_v38, 0.0 }
 0x103   :  { %v273_v43 = vpop.permute.xlu1 %272 }
 0x104   :  { %v415_v45 = vpack.c.bf16 %v369_v42, %v368_v41  ;;  %1302 = vperm.xlu1 %1598, %v1236_v39   ;;  %v350_v48 = vadd.f32 %v273_v43, %v238_v46  ;;  %v2180_v24 = vpop.permute.xlu0 %496 }
 0x106   :  { %1542 = vmatprep.subr.bf16.mxu0 %v415_v45  ;;  %v366_v51 = vmax.f32 %v350_v48, 0.0 }
 0x107   :  { %v278_v50 = vpop.permute.xlu1 %277  ;;  %1543 = vmatpush3.bf16.msra.mxu0 %v415_v45 }
 0x108   :  { %v351_v8 = vadd.f32 %v278_v50, %v239_v49  ;;  %1307 = vperm.xlu1 %1598, %v1237_v47   ;;  %v2184_v25 = vpop.permute.xlu0 %566 }
 0x10a   :  { %v367_v15 = vmax.f32 %v351_v8, 0.0 }
 0x10b   :  { %v2154_v9 = vpop.permute.xlu1 %611 }
 0x10c   :  { %v414_v53 = vpack.c.bf16 %v367_v15, %v366_v51  ;;  %1317 = vperm.xlu1 %1598, %v1239_v14   ;;  %v487_v27 = vpop.permute.xlu0 %486 }
 0x10e   :  { %1544 = vmatprep.subr.bf16.mxu0 %v414_v53 }
 0x10f   :  { %1545 = vmatpush3.bf16.msra.mxu0 %v414_v53  ;;  %v2158_v11 = vpop.permute.xlu1 %531 }
 0x110   :  { %v2191_v30 = vpop.permute.xlu0 %556 }
 0x112   :  { %1547 = vmatmul.mubr.bf16.vlgmr.msra.gmra.mxu0 %v1600_v54 }
 0x113   :  { %1550 = vmatprep.mubr.bf16.mxu0 %v1601_v56  ;;  %v2162_v13 = vpop.permute.xlu1 %601 }
 0x114   :  { %v477_v32 = vpop.permute.xlu0 %476 }
 0x117   :  { %v2166_v17 = vpop.permute.xlu1 %521 }
 0x118   :  { %v2195_v34 = vpop.permute.xlu0 %546 }
 0x11a   :  { %1551 = vmatmul.mubr.bf16.gmra.mxu0 %v1602_v57 }
 0x11b   :  { %1554 = vmatprep.mubr.bf16.mxu0 %v1603_v58  ;;  %v2170_v19 = vpop.permute.xlu1 %591 }
 0x11c   :  { %v467_v55 = vpop.permute.xlu0 %466 }
 0x11f   :  { %v2174_v21 = vpop.permute.xlu1 %511 }
 0x120   :  { %v2199_v36 = vpop.permute.xlu0 %536 }
 0x122   :  { %1555 = vmatmul.mubr.bf16.gmra.mxu0 %v1604_v60 }
 0x123   :  { %1558 = vmatprep.mubr.bf16.mxu0 %v1605_v59  ;;  %v2178_v23 = vpop.permute.xlu1 %581 }
 0x124   :  { %v457_v41 = vpop.permute.xlu0 %456 }
 0x127   :  { %v2182_v0 = vpop.permute.xlu1 %501 }
 0x12a   :  { %1559 = vmatmul.mubr.bf16.gmra.mxu0 %v1606_v61 }
 0x12b   :  { %1562 = vmatprep.mubr.bf16.mxu0 %v1607_v62  ;;  %v2186_v26 = vpop.permute.xlu1 %571 }
 0x12f   :  { %v492_v29 = vpop.permute.xlu1 %491 }
 0x132   :  { %1563 = vmatmul.mubr.bf16.gmra.mxu0 %v1608_v63 }
 0x133   :  { %1566 = vmatprep.mubr.bf16.mxu0 %v1609_v1  ;;  %v2193_v31 = vpop.permute.xlu1 %561 }
 0x137   :  { %v482_v33 = vpop.permute.xlu1 %481 }
 0x13a   :  { %1567 = vmatmul.mubr.bf16.gmra.mxu0 %v1610_v2 }
 0x13b   :  { %1570 = vmatprep.mubr.bf16.mxu0 %v1611_v3  ;;  %v2197_v35 = vpop.permute.xlu1 %551 }
 0x13f   :  { %v472_v37 = vpop.permute.xlu1 %471 }
 0x142   :  { %1571 = vmatmul.mubr.bf16.gmra.mxu0 %v1612_v52 }
 0x143   :  { %1574 = vmatprep.mubr.bf16.mxu0 %v1613_v5  ;;  %v2201_v38 = vpop.permute.xlu1 %541 }
 0x147   :  { %v462_v45 = vpop.permute.xlu1 %461 }
 0x14a   :  { %1575 = vmatmul.mubr.bf16.gmra.mxu0 %v1614_v6 }
 0x1d2   :  { %v1548_v39 = vpop.f32.mrf.mxu0 }
 0x1d3   :  { %v753_v40 = vadd.f32 %v1548_v39, %v467_v55 }
 0x1d4   :  { %v744_v4 = vpop.f32.mrf.mxu0 }
 0x1d5   :  { %v745_v43 = vadd.f32 %v744_v4, %v457_v41  ;;  %v873_v47 = vmax.f32 %v753_v40, 0.0 }
 0x1d6   :  { %v1549_v42 = vpop.f32.mrf.mxu0 }
 0x1d7   :  { %v756_v44 = vadd.f32 %v1549_v42, %v472_v37  ;;  %v871_v8 = vmax.f32 %v745_v43, 0.0 }
 0x1d8   :  { %v747_v46 = vpop.f32.mrf.mxu0 }
 0x1d9   :  { %v874_v48 = vmax.f32 %v756_v44, 0.0  ;;  %v748_v49 = vadd.f32 %v747_v46, %v462_v45 }
 0x1da   :  { %v1552_v50 = vpop.f32.mrf.mxu0 }
 0x1db   :  { %v2203_v14 = vpack.c.bf16 %v874_v48, %v873_v47  ;;  %v872_v51 = vmax.f32 %v748_v49, 0.0  ;;  %v769_v54 = vadd.f32 %v1552_v50, %v487_v27 }
 0x1dc   :  { %v760_v15 = vpop.f32.mrf.mxu0 }
 0x1dd   :  { %v2205_v53 = vpack.c.bf16 %v872_v51, %v871_v8  ;;  %v761_v57 = vadd.f32 %v760_v15, %v477_v32  ;;  %v877_v59 = vmax.f32 %v769_v54, 0.0 }
 0x1de   :  { %v1553_v56 = vpop.f32.mrf.mxu0 }
 0x1df   :  { %v772_v58 = vadd.f32 %v1553_v56, %v492_v29  ;;  %v875_v1 = vmax.f32 %v761_v57, 0.0 }
 0x1e0   :  { %v763_v60 = vpop.f32.mrf.mxu0 }
 0x1e1   :  { %v878_v61 = vmax.f32 %v772_v58, 0.0  ;;  %v764_v62 = vadd.f32 %v763_v60, %v482_v33 }
 0x1e2   :  { %v1556_v63 = vpop.f32.mrf.mxu0 }
 0x1e3   :  { %v2207_v2 = vpack.c.bf16 %v878_v61, %v877_v59  ;;  %v876_v3 = vmax.f32 %v764_v62, 0.0 }
 0x1e4   :  { %v776_v52 = vpop.f32.mrf.mxu0 }
 0x1e5   :  { %v2209_v5 = vpack.c.bf16 %v876_v3, %v875_v1 }
 0x1e6   :  { %v1557_v6 = vpop.f32.mrf.mxu0 }
 0x1e8   :  { %v779_v28 = vpop.f32.mrf.mxu0 }
 0x1ea   :  { %v1560_v55 = vpop.f32.mrf.mxu0 }
 0x1eb   :  { %v801_v51 = vadd.f32 %v1560_v55, %v2156_v10 }
 0x1ec   :  { %v792_v37 = vpop.f32.mrf.mxu0 }
 0x1ed   :  { %v885_v1 = vmax.f32 %v801_v51, 0.0 }
 0x1ee   :  { %v1561_v27 = vpop.f32.mrf.mxu0 }
 0x1ef   :  { %v804_v49 = vadd.f32 %v1561_v27, %v2158_v11 }
 0x1f0   :  { %v795_v39 = vpop.f32.mrf.mxu0 }
 0x1f1   :  { %v886_v57 = vmax.f32 %v804_v49, 0.0  ;;  %v796_v58 = vadd.f32 %v795_v39, %v2166_v17 }
 0x1f2   :  { %v2211_v32 = vpop.f32.mrf.mxu0 }
 0x1f3   :  { %v884_v27 = vmax.f32 %v796_v58, 0.0  ;;  %v1630_v58 = vld [vmem:[%s2332_s5 + $0x54] ss:$8 sps:$4 sm:$0xff]  }
 0x1f4   :  { %v2213_v29 = vpop.f32.mrf.mxu0 }
 0x1f6   :  { %v2215_v4 = vpop.f32.mrf.mxu0 }
 0x1f8   :  { %v2217_v33 = vpop.f32.mrf.mxu0 }
 0x1fa   :  { %v1568_v40 = vpop.f32.mrf.mxu0 }
 0x1fc   :  { %v824_v41 = vpop.f32.mrf.mxu0 }
 0x1fe   :  { %v1569_v42 = vpop.f32.mrf.mxu0 }
 0x200   :  { %v827_v43 = vpop.f32.mrf.mxu0 }
 0x202   :  { %v1572_v44 = vpop.f32.mrf.mxu0 }
 0x203   :  { %v849_v10 = vadd.f32 %v1572_v44, %v2168_v18 }
 0x204   :  { %v840_v45 = vpop.f32.mrf.mxu0 }
 0x205   :  { %v897_v49 = vmax.f32 %v849_v10, 0.0 }
 0x206   :  { %v1573_v46 = vpop.f32.mrf.mxu0 }
 0x207   :  { %v852_v59 = vadd.f32 %v1573_v46, %v2170_v19  ;;  %v785_v46 = vadd.f32 %v1556_v63, %v2172_v20  ;;  %v833_v20 = vadd.f32 %v1568_v40, %v2184_v25  ;;  %v817_v40 = vadd.f32 %v2211_v32, %v2195_v34  ;;  %v1626_v32 = vld [vmem:[%s2332_s5 + $0x30] ss:$8 sps:$4 sm:$0xff]  }
 0x208   :  { %v843_v47 = vpop.f32.mrf.mxu0 }
 0x209   :  { %v898_v17 = vmax.f32 %v852_v59, 0.0  ;;  %v844_v39 = vadd.f32 %v843_v47, %v2178_v23  ;;  %v777_v23 = vadd.f32 %v776_v52, %v2180_v24  ;;  %v820_v24 = vadd.f32 %v2215_v4, %v2197_v35  ;;  %v1633_v59 = vld [vmem:[%s2332_s5 + $0x64] ss:$8 sps:$4 sm:$0xff]  }
 0x20a   :  { %v1576_v48 = vpop.f32.mrf.mxu0 }
 0x20b   :  { %v865_v8 = vadd.f32 %v1576_v48, %v2152_v7  ;;  %v793_v7 = vadd.f32 %v792_v37, %v2164_v16  ;;  %v926_v48 = vpack.c.bf16 %v886_v57, %v885_v1  ;;  %v841_v16 = vadd.f32 %v840_v45, %v2176_v22  ;;  %v954_v1 = vpop.permute.xlu0 %953 }
 0x20c   :  { %v856_v50 = vpop.f32.mrf.mxu0  ;;  %v780_v37 = vadd.f32 %v779_v28, %v2182_v0  ;;  %v828_v45 = vadd.f32 %v827_v43, %v2193_v31  ;;  %v879_v0 = vmax.f32 %v777_v23, 0.0  ;;  %v893_v28 = vmax.f32 %v833_v20, 0.0 }
 0x20d   :  { %v857_v54 = vadd.f32 %v856_v50, %v2160_v12  ;;  %v901_v61 = vmax.f32 %v865_v8, 0.0  ;;  %v896_v50 = vmax.f32 %v844_v39, 0.0  ;;  %v881_v8 = vmax.f32 %v785_v46, 0.0 }
 0x20e   :  { %v1577_v15 = vpop.f32.mrf.mxu0  ;;  %v895_v63 = vmax.f32 %v841_v16, 0.0  ;;  %v880_v51 = vmax.f32 %v780_v37, 0.0  ;;  %v892_v25 = vmax.f32 %v828_v45, 0.0  ;;  %v890_v31 = vmax.f32 %v820_v24, 0.0 }
 0x20f   :  { %v868_v56 = vadd.f32 %v1577_v15, %v2154_v9  ;;  %v899_v3 = vmax.f32 %v857_v54, 0.0  ;;  %v788_v9 = vadd.f32 %v1557_v6, %v2174_v21  ;;  %v836_v21 = vadd.f32 %v1569_v42, %v2186_v26  ;;  %v964_v10 = vpop.permute.xlu0 %963 }
 0x210   :  { %v859_v60 = vpop.f32.mrf.mxu0  ;;  %v932_v6 = vpack.c.bf16 %v898_v17, %v897_v49  ;;  %v931_v15 = vpack.c.bf16 %v896_v50, %v895_v63  ;;  %v825_v26 = vadd.f32 %v824_v41, %v2191_v30  ;;  %v923_v42 = vpack.c.bf16 %v880_v51, %v879_v0 }
 0x211   :  { %v902_v62 = vmax.f32 %v868_v56, 0.0  ;;  %v860_v11 = vadd.f32 %v859_v60, %v2162_v13  ;;  %v883_v13 = vmax.f32 %v793_v7, 0.0  ;;  %v882_v18 = vmax.f32 %v788_v9, 0.0  ;;  %v1632_v60 = vld [vmem:[%s2332_s5 + $0x50] ss:$8 sps:$4 sm:$0xff]   ;;  %v959_v7 = vpop.permute.xlu1 %958 }
 0x212   :  { %v894_v22 = vmax.f32 %v836_v21, 0.0  ;;  %v891_v54 = vmax.f32 %v825_v26, 0.0  ;;  %v812_v43 = vadd.f32 %v2217_v33, %v2201_v38  ;;  %v889_v30 = vmax.f32 %v817_v40, 0.0  ;;  %v1615_v38 = vld [vmem:[%s2332_s5] ss:$8 sps:$4 sm:$0xff]  }
 0x213   :  { %v900_v55 = vmax.f32 %v860_v11, 0.0  ;;  %v934_v12 = vpack.c.bf16 %v902_v62, %v901_v61  ;;  %v925_v44 = vpack.c.bf16 %v884_v27, %v883_v13  ;;  %v924_v47 = vpack.c.bf16 %v882_v18, %v881_v8  ;;  %v1629_v33 = vld [vmem:[%s2332_s5 + $0x40] ss:$8 sps:$4 sm:$0xff]   ;;  %v1636_v62 = vld [vmem:[%s2332_s5 + $0x74] ss:$8 sps:$4 sm:$0xff]  }
 0x214   :  { %v930_v52 = vpack.c.bf16 %v894_v22, %v893_v28  ;;  %v929_v56 = vpack.c.bf16 %v892_v25, %v891_v54  ;;  %v809_v41 = vadd.f32 %v2213_v29, %v2199_v36  ;;  %v928_v35 = vpack.c.bf16 %v890_v31, %v889_v30  ;;  %v1618_v36 = vld [vmem:[%s2332_s5 + $0x14] ss:$8 sps:$4 sm:$0xff]   ;;  %v1627_v29 = vld [vmem:[%s2332_s5 + $0x44] ss:$8 sps:$4 sm:$0xff]   ;;  %v1635_v61 = vld [vmem:[%s2332_s5 + $0x60] ss:$8 sps:$4 sm:$0xff]  }
 0x215   :  { %v933_v19 = vpack.c.bf16 %v900_v55, %v899_v3  ;;  %1466 = vmatprep.subr.bf16.mxu1 %v934_v12  ;;  %v888_v4 = vmax.f32 %v812_v43, 0.0  ;;  %v1638_v11 = vld [vmem:[%s2332_s5 + $0x70] ss:$8 sps:$4 sm:$0xff]   ;;  %v969_v3 = vpop.permute.xlu1 %968  ;;  %v1243_v55 = vpop.permute.xlu0 %1242 }
 0x216   :  { %1467 = vmatpush3.bf16.msra.mxu1 %v926_v48  ;;  %v887_v57 = vmax.f32 %v809_v41, 0.0 }
 0x217   :  { %1468 = vmatprep.subr.bf16.mxu1 %v933_v19 }
 0x218   :  { %v927_v34 = vpack.c.bf16 %v888_v4, %v887_v57 }
 0x219   :  { %v1248_v12 = vpop.permute.xlu1 %1247  ;;  %v974_v9 = vpop.permute.xlu0 %973 }
 0x21a   :  { %1469 = vmatpush3.bf16.msra.mxu1 %v925_v44 }
 0x21b   :  { %1470 = vmatprep.subr.bf16.mxu1 %v932_v6 }
 0x21d   :  { %v1253_v27 = vpop.permute.xlu1 %1252  ;;  %v979_v48 = vpop.permute.xlu0 %978 }
 0x21e   :  { %1471 = vmatpush3.bf16.msra.mxu1 %v924_v47 }
 0x21f   :  { %1472 = vmatprep.subr.bf16.mxu1 %v931_v15 }
 0x221   :  { %v1258_v17 = vpop.permute.xlu1 %1257  ;;  %v984_v46 = vpop.permute.xlu0 %983 }
 0x222   :  { %1473 = vmatpush3.bf16.msra.mxu1 %v923_v42 }
 0x223   :  { %1474 = vmatprep.subr.bf16.mxu1 %v930_v52 }
 0x225   :  { %v1263_v49 = vpop.permute.xlu1 %1262  ;;  %v989_v37 = vpop.permute.xlu0 %988 }
 0x226   :  { %1475 = vmatpush3.bf16.msra.mxu1 %v2207_v2  ;;  %v1620_v2 = vld [vmem:[%s2332_s5 + $0x10] ss:$8 sps:$4 sm:$0xff]  }
 0x227   :  { %1476 = vmatprep.subr.bf16.mxu1 %v929_v56 }
 0x229   :  { %v2296_v21 = vpop.permute.xlu1 %1267  ;;  %v994_v8 = vpop.permute.xlu0 %993 }
 0x22a   :  { %1477 = vmatpush3.bf16.msra.mxu1 %v2209_v5  ;;  %v1624_v5 = vld [vmem:[%s2332_s5 + $0x34] ss:$8 sps:$4 sm:$0xff]  }
 0x22b   :  { %1478 = vmatprep.subr.bf16.mxu1 %v928_v35 }
 0x22d   :  { %v2298_v20 = vpop.permute.xlu1 %1272  ;;  %v999_v51 = vpop.permute.xlu0 %998 }
 0x22e   :  { %1479 = vmatpush3.bf16.msra.mxu1 %v2203_v14  ;;  %v1621_v14 = vld [vmem:[%s2332_s5 + $0x24] ss:$8 sps:$4 sm:$0xff]  }
 0x22f   :  { %1480 = vmatprep.subr.bf16.mxu1 %v927_v34 }
 0x231   :  { %v2300_v45 = vpop.permute.xlu1 %1277  ;;  %v1004_v24 = vpop.permute.xlu0 %1003 }
 0x232   :  { %1481 = vmatpush3.bf16.msra.mxu1 %v2205_v53  ;;  %v1623_v53 = vld [vmem:[%s2332_s5 + $0x20] ss:$8 sps:$4 sm:$0xff]   ;;  %s1667_s5 = smov [#allocation3]  }
 0x233   :  { %s1399_s20 = sshll.u32 %s1667_s5, 4  ;;  %s1400_s20 = int_to_ptr.vmem [resolvable:$true] %s1399_s20 }
 0x234   :  { %s1643_s21 = scalar_lea.vmem %s1400_s20, 16  ;;  %s1647_s7 = scalar_lea.vmem %s1400_s20, 32 }
 0x235   :  { %1144 = vmatmul.mubr.bf16.vlgmr.msra.gmra.mxu1 %v1615_v38  ;;  %v2302_v54 = vpop.permute.xlu1 %1282  ;;  %v1009_v34 = vpop.permute.xlu0 %1008  ;;  %p1644_p0 = scmp.ne.s32.totalorder %s1400_s20, %s1643_s21  ;;  %p1648_p1 = scmp.lt.s32.totalorder %s1400_s20, %s1400_s20 }
 0x236   :  { %1151 = vmatprep.mubr.bf16.mxu1 %v1618_v36  ;;  %p1649_p2 = scmp.lt.s32.totalorder %s1647_s7, %s1643_s21 }
 0x238   :  { %p1650_p3 = por %p1649_p2, %p1648_p1 }
 0x23a   :  { %p1651_p4 = pnand %p1650_p3, %p1644_p0 }
 0x23d   :  { %1152 = vmatmul.mubr.bf16.gmra.mxu1 %v1620_v2 }
 0x23e   :  { %1159 = vmatprep.mubr.bf16.mxu1 %v1621_v14 }
 0x245   :  { %1160 = vmatmul.mubr.bf16.gmra.mxu1 %v1623_v53 }
 0x246   :  { %1167 = vmatprep.mubr.bf16.mxu1 %v1624_v5  ;;  %v1288_v5 = vpop.permute.xlu1 %1287 }
 0x24d   :  { %1168 = vmatmul.mubr.bf16.gmra.mxu1 %v1626_v32 }
 0x24e   :  { %1175 = vmatprep.mubr.bf16.mxu1 %v1627_v29 }
 0x255   :  { %1176 = vmatmul.mubr.bf16.gmra.mxu1 %v1629_v33 }
 0x256   :  { %1183 = vmatprep.mubr.bf16.mxu1 %v1630_v58 }
 0x25d   :  { %1184 = vmatmul.mubr.bf16.gmra.mxu1 %v1632_v60 }
 0x25e   :  { %1191 = vmatprep.mubr.bf16.mxu1 %v1633_v59 }
 0x265   :  { %1192 = vmatmul.mubr.bf16.gmra.mxu1 %v1635_v61 }
 0x266   :  { %1199 = vmatprep.mubr.bf16.mxu1 %v1636_v62 }
 0x26d   :  { %1200 = vmatmul.mubr.bf16.gmra.mxu1 %v1638_v11 }
 0x2f5   :  { %v1482_v39 = vpop.f32.mrf.mxu1 }
 0x2f7   :  { %v1483_v19 = vpop.f32.mrf.mxu1 }
 0x2f8   :  { %v1484_v28 = vadd.f32 %v1483_v19, %v1482_v39 }
 0x2f9   :  { %v1485_v13 = vpop.f32.mrf.mxu1 }
 0x2fa   :  { %v1146_v31 = vadd.f32 %v1484_v28, %v954_v1 }
 0x2fb   :  { %v1486_v16 = vpop.f32.mrf.mxu1 }
 0x2fc   :  { %v1487_v15 = vadd.f32 %v1486_v16, %v1485_v13  ;;  %v1208_v38 = vmax.f32 %v1146_v31, 0.0 }
 0x2fd   :  { %v1488_v18 = vpop.f32.mrf.mxu1 }
 0x2fe   :  { %v1149_v52 = vadd.f32 %v1487_v15, %v959_v7  ;;  %v1320_v59 = vmul.f32 %v1243_v55, %v1208_v38 }
 0x2ff   :  { %v1489_v44 = vpop.f32.mrf.mxu1 }
 0x300   :  { %v1490_v42 = vadd.f32 %v1489_v44, %v1488_v18  ;;  %v1209_v41 = vmax.f32 %v1149_v52, 0.0  ;;  %v1337_v18 = vsel %vm1336_vm0, %v1320_v59, 0.0 }
 0x301   :  { %v1491_v6 = vpop.f32.mrf.mxu1 }
 0x302   :  { %v1154_v30 = vadd.f32 %v1490_v42, %v964_v10  ;;  %v1321_v32 = vmul.f32 %v1248_v12, %v1209_v41  ;;  %v1014_v10 = vpop.permute.xlu0 %1013  ;;  %v1293_v12 = vpop.permute.xlu1 %1292 }
 0x303   :  { %v1492_v50 = vpop.f32.mrf.mxu1 }
 0x304   :  { %v1493_v40 = vadd.f32 %v1492_v50, %v1491_v6  ;;  %v1210_v14 = vmax.f32 %v1154_v30, 0.0 }
 0x305   :  { %v1494_v23 = vpop.f32.mrf.mxu1 }
 0x306   :  { %v1157_v4 = vadd.f32 %v1493_v40, %v969_v3  ;;  %v1322_v11 = vmul.f32 %v1253_v27, %v1210_v14  ;;  %v1338_v3 = vsel %vm1336_vm0, %v1321_v32, 0.0 }
 0x307   :  { %v1495_v63 = vpop.f32.mrf.mxu1 }
 0x308   :  { %v1496_v43 = vadd.f32 %v1495_v63, %v1494_v23  ;;  %v1211_v33 = vmax.f32 %v1157_v4, 0.0  ;;  %v1340_v55 = vsel %vm1336_vm0, %v1322_v11, 0.0 }
 0x309   :  { %v1497_v47 = vpop.f32.mrf.mxu1 }
 0x30a   :  { %v1162_v36 = vadd.f32 %v1496_v43, %v974_v9  ;;  %v1323_v39 = vmul.f32 %v1258_v17, %v1211_v33 }
 0x30b   :  { %v1498_v22 = vpop.f32.mrf.mxu1 }
 0x30c   :  { %v1499_v57 = vadd.f32 %v1498_v22, %v1497_v47  ;;  %v1212_v61 = vmax.f32 %v1162_v36, 0.0  ;;  %v1342_v63 = vsel %vm1336_vm0, %v1323_v39, 0.0 }
 0x30d   :  { %v1500_v0 = vpop.f32.mrf.mxu1 }
 0x30e   :  { %v1165_v58 = vadd.f32 %v1499_v57, %v979_v48  ;;  %v1324_v48 = vmul.f32 %v1263_v49, %v1212_v61 }
 0x30f   :  { %v1501_v26 = vpop.f32.mrf.mxu1 }
 0x310   :  { %v1502_v53 = vadd.f32 %v1501_v26, %v1500_v0  ;;  %v1213_v19 = vmax.f32 %v1165_v58, 0.0  ;;  %v1344_v0 = vsel %vm1336_vm0, %v1324_v48, 0.0 }
 0x311   :  { %v1503_v25 = vpop.f32.mrf.mxu1 }
 0x312   :  { %v1170_v1 = vadd.f32 %v1502_v53, %v984_v46  ;;  %v1339_v46 = vadd.f32 %v1338_v3, %v1337_v18  ;;  %v1325_v47 = vmul.f32 %v2296_v21, %v1213_v19 }
 0x313   :  { %v1504_v56 = vpop.f32.mrf.mxu1 }
 0x314   :  { %v1505_v60 = vadd.f32 %v1504_v56, %v1503_v25  ;;  %v1214_v6 = vmax.f32 %v1170_v1, 0.0  ;;  %v1341_v15 = vadd.f32 %v1340_v55, %v1339_v46  ;;  %v1346_v31 = vsel %vm1336_vm0, %v1325_v47, 0.0 }
 0x315   :  { %v1506_v35 = vpop.f32.mrf.mxu1 }
 0x316   :  { %v1173_v13 = vadd.f32 %v1505_v60, %v989_v37  ;;  %v1019_v37 = vpop.permute.xlu0 %1018  ;;  %v1326_v49 = vmul.f32 %v2298_v20, %v1214_v6  ;;  %v1343_v25 = vadd.f32 %v1342_v63, %v1341_v15 }
 0x317   :  { %v1507_v2 = vpop.f32.mrf.mxu1 }
 0x318   :  { %v1508_v7 = vadd.f32 %v1507_v2, %v1506_v35  ;;  %v1215_v17 = vmax.f32 %v1173_v13, 0.0  ;;  %v1348_v41 = vsel %vm1336_vm0, %v1326_v49, 0.0 }
 0x319   :  { %v1509_v29 = vpop.f32.mrf.mxu1 }
 0x31a   :  { %v1178_v50 = vadd.f32 %v1508_v7, %v994_v8  ;;  %v1298_v8 = vpop.permute.xlu1 %1297  ;;  %v1327_v43 = vmul.f32 %v2300_v45, %v1215_v17  ;;  %v1024_v57 = vpop.permute.xlu0 %1023 }
 0x31b   :  { %v1510_v62 = vpop.f32.mrf.mxu1 }
 0x31c   :  { %v1511_v16 = vadd.f32 %v1510_v62, %v1509_v29  ;;  %v1216_v26 = vmax.f32 %v1178_v50, 0.0  ;;  %v1350_v36 = vsel %vm1336_vm0, %v1327_v43, 0.0 }
 0x31d   :  { %v1512_v9 = vpop.f32.mrf.mxu1 }
 0x31e   :  { %v1181_v22 = vadd.f32 %v1511_v16, %v999_v51  ;;  %v1345_v51 = vadd.f32 %v1344_v0, %v1343_v25  ;;  %v1328_v35 = vmul.f32 %v2302_v54, %v1216_v26  ;;  %v1303_v32 = vpop.permute.xlu1 %1302  ;;  %v1029_v1 = vpop.permute.xlu0 %1028 }
 0x31f   :  { %v1513_v44 = vpop.f32.mrf.mxu1 }
 0x320   :  { %v1514_v27 = vadd.f32 %v1513_v44, %v1512_v9  ;;  %v1217_v21 = vmax.f32 %v1181_v22, 0.0 }
 0x321   :  { %v1515_v23 = vpop.f32.mrf.mxu1 }
 0x322   :  { %v1186_v42 = vadd.f32 %v1514_v27, %v1004_v24  ;;  %v1347_v24 = vadd.f32 %v1346_v31, %v1345_v51  ;;  %v1329_v2 = vmul.f32 %v1288_v5, %v1217_v21  ;;  %v1308_v19 = vpop.permute.xlu1 %1307  ;;  %v1313_v46 = vpop.permute.xlu0 %1312 }
 0x323   :  { %v1516_v28 = vpop.f32.mrf.mxu1 }
 0x324   :  { %v1517_v52 = vadd.f32 %v1516_v28, %v1515_v23  ;;  %v1218_v4 = vmax.f32 %v1186_v42, 0.0  ;;  %v1349_v45 = vadd.f32 %v1348_v41, %v1347_v24  ;;  %v1354_v61 = vsel %vm1336_vm0, %v1329_v2, 0.0 }
 0x325   :  { %v1518_v40 = vpop.f32.mrf.mxu1 }
 0x326   :  { %v1189_v56 = vadd.f32 %v1517_v52, %v1009_v34  ;;  %v1352_v34 = vsel %vm1336_vm0, %v1328_v35, 0.0  ;;  %v1330_v33 = vmul.f32 %v1293_v12, %v1218_v4  ;;  %v1351_v59 = vadd.f32 %v1350_v36, %v1349_v45  ;;  %v1318_v0 = vpop.permute.xlu1 %1317  ;;  %v1378_v51 = vpop.permute.xlu0 %1377 }
 0x327   :  { %v1519_v30 = vpop.f32.mrf.mxu1  ;;  %v1380_v52 = vlaneseq }
 0x328   :  { %v1520_v20 = vadd.f32 %v1519_v30, %v1518_v40  ;;  %v1219_v14 = vmax.f32 %v1189_v56, 0.0  ;;  %v1353_v7 = vadd.f32 %v1352_v34, %v1351_v59  ;;  %v1356_v5 = vsel %vm1336_vm0, %v1330_v33, 0.0 }
 0x329   :  { %v1521_v38 = vpop.f32.mrf.mxu1  ;;  %v1381_v40 = vshrl.u32 %v1380_v52, 7 }
 0x32a   :  { %v1194_v53 = vadd.f32 %v1520_v20, %v1014_v10  ;;  %v1331_v62 = vmul.f32 %v1298_v8, %v1219_v14  ;;  %v1355_v13 = vadd.f32 %v1354_v61, %v1353_v7 }
 0x32b   :  { %v1522_v29 = vpop.f32.mrf.mxu1  ;;  %v1382_v21 = vsub.s32 0, %v1381_v40 }
 0x32c   :  { %v1220_v58 = vmax.f32 %v1194_v53, 0.0  ;;  %v1523_v60 = vadd.f32 %v1522_v29, %v1521_v38  ;;  %v1358_v12 = vsel %vm1336_vm0, %v1331_v62, 0.0  ;;  %v1357_v44 = vadd.f32 %v1356_v5, %v1355_v13 }
 0x32d   :  { %v1524_v54 = vpop.f32.mrf.mxu1  ;;  %v1383_v41 = vrot.slane %v1378_v51, %v1382_v21 }
 0x32e   :  { %v1197_v11 = vadd.f32 %v1523_v60, %v1019_v37  ;;  %v1332_v10 = vmul.f32 %v1303_v32, %v1220_v58  ;;  %v1359_v23 = vadd.f32 %v1358_v12, %v1357_v44 }
 0x32f   :  { %v1525_v3 = vpop.f32.mrf.mxu1 }
 0x330   :  { %v1221_v9 = vmax.f32 %v1197_v11, 0.0  ;;  %v1526_v39 = vadd.f32 %v1525_v3, %v1524_v54  ;;  %v1360_v6 = vsel %vm1336_vm0, %v1332_v10, 0.0 }
 0x331   :  { %v1527_v16 = vpop.f32.mrf.mxu1  ;;  %v1361_v22 = vadd.f32 %v1360_v6, %v1359_v23 }
 0x332   :  { %v1333_v18 = vmul.f32 %v1308_v19, %v1221_v9  ;;  %v1202_v48 = vadd.f32 %v1526_v39, %v1024_v57 }
 0x333   :  { %v1528_v55 = vpop.f32.mrf.mxu1 }
 0x334   :  { %v1222_v50 = vmax.f32 %v1202_v48, 0.0  ;;  %v1529_v27 = vadd.f32 %v1528_v55, %v1527_v16  ;;  %v1362_v63 = vsel %vm1336_vm0, %v1333_v18, 0.0 }
 0x335   :  { %v1363_v28 = vadd.f32 %v1362_v63, %v1361_v22 }
 0x336   :  { %v1334_v47 = vmul.f32 %v1313_v46, %v1222_v50  ;;  %v1205_v17 = vadd.f32 %v1529_v27, %v1029_v1 }
 0x338   :  { %v1364_v37 = vsel %vm1336_vm0, %v1334_v47, 0.0  ;;  %v1223_v15 = vmax.f32 %v1205_v17, 0.0 }
 0x339   :  { %v1365_v26 = vadd.f32 %v1364_v37, %v1363_v28 }
 0x33a   :  { %v1335_v49 = vmul.f32 %v1318_v0, %v1223_v15 }
 0x33c   :  { %v1366_v42 = vsel %vm1336_vm0, %v1335_v49, 0.0 }
 0x33d   :  { %v1367_v8 = vadd.f32 %v1366_v42, %v1365_v26 }
 0x33f   :  { %v1368_v25 = vrot.slane %v1367_v8, 4 }
 0x341   :  { %v1369_v31 = vadd.f32 %v1368_v25, %v1367_v8 }
 0x343   :  { %v1370_v43 = vrot.slane %v1369_v31, 2 }
 0x345   :  { %v1371_v56 = vadd.f32 %v1370_v43, %v1369_v31 }
 0x347   :  { %v1372_v30 = vrot.slane %v1371_v56, 1 }
 0x349   :  { %v1373_v35 = vadd.f32 %v1372_v30, %v1371_v56 }
 0x34b   :  { %v1384_v4 = vadd.f32 %v1383_v41, %v1373_v35 }
 0x34d   :  { %v1441_v20 = vmul.f32 -1.442695, %v1384_v4 }
 0x34f   :  { %1639 = vpow2.f32 %v1441_v20 }
 0x35c   :  { %v1640_v57 = vpop.eup %1639 }
 0x35d   :  { %v1388_v24 = vadd.f32 1.0, %v1640_v57 }
 0x35f   :  { %1641 = vrcp.f32 %v1388_v24 }
 0x36c   :  { %v1642_v38 = vpop.eup %1641 }
 0x36d   :  { %1392 = vst.msk [vmem:[#allocation3] sm:$0x1] %vm1391_vm1, %v1642_v38 }
 0x36e   :  { %1654 = shalt.err (!%p1651_p4)
}
 0x36f   :  { %1402 = dma.vmem_to_hbm [thread:$0]  %s1400_s20, 16, %s2336_s9, [#allocation4]  }
 0x370   :  { %1663 = dma.done.wait [#allocation4], 16  }
 0x371   :  { %1664 = vsyncadd [#allocation4], 4294967280 }
 0x372   :  { %1406 = vsyncpa [#allocation4], 1 }

</bundles_post_ra>
